<compile_context>
chip_gen: v5e
topology: v5e:2x2
jax: 0.10.0
libtpu: 0.0.40
codegen_flags: <defaults>
</compile_context>

<pallas_src>
import functools

import numpy as np
import jax
import jax.numpy as jnp
from jax.experimental import pallas as pl
from jax.experimental.pallas import tpu as pltpu


# ----------------------------------------------------------------------------
# Kernel bodies
# ----------------------------------------------------------------------------
def _logits_loss_body(t_logits_ref, s_logits_ref, labels_ref,
                      train_ref, soft_ref, *, temperature, logits_mse):
    """Student cross-entropy (train_loss) + distillation soft_loss."""
    t = t_logits_ref[...].astype(jnp.float32)          # [B, C]
    s = s_logits_ref[...].astype(jnp.float32)          # [B, C]
    B, C = s.shape

    # ---- student cross-entropy (what BertForSequenceClassification returns) ----
    s_max = jnp.max(s, axis=-1, keepdims=True)          # reused below
    z = s - s_max
    lse = jnp.log(jnp.sum(jnp.exp(z), axis=-1, keepdims=True))
    logp = z - lse                                       # [B, C]
    cls_ids = jax.lax.broadcasted_iota(jnp.int32, (B, C), 1)
    onehot = (cls_ids == labels_ref[...]).astype(jnp.float32)   # labels: [B, 1]
    train_ref[0, 0] = -jnp.sum(onehot * logp) * (1.0 / B)

    # ---- soft (distillation) loss ----
    if logits_mse:
        d = t - s
        soft_ref[0, 0] = jnp.sum(d * d) * (1.0 / (B * C))
    else:
        T = float(temperature)
        inv_T = 1.0 / T

        # softmax(x / T) computed as exp((x - max(x)) / T) / sum(...); for the
        # student we reuse s_max computed above (max(s/T) == max(s)/T, T > 0).
        e_s = jnp.exp(z * inv_T)
        p_s = e_s * pl.reciprocal(jnp.sum(e_s, axis=-1, keepdims=True))

        t_max = jnp.max(t, axis=-1, keepdims=True)
        e_t = jnp.exp((t - t_max) * inv_T)
        p_t = e_t * pl.reciprocal(jnp.sum(e_t, axis=-1, keepdims=True))

        d = p_t - p_s
        soft_ref[0, 0] = (jnp.sum(d * d) * (1.0 / (B * C))) * (T * T)


def _fused_kernel(t_logits_ref, s_logits_ref, labels_ref, t_cls_ref, s_cls_ref,
                  train_ref, soft_ref, pkd_ref, *, temperature, logits_mse):
    """Single-block fused kernel: logits losses + full PKD reduction."""
    _logits_loss_body(t_logits_ref, s_logits_ref, labels_ref,
                      train_ref, soft_ref,
                      temperature=temperature, logits_mse=logits_mse)

    # ---- PKD loss over all student layers at once (no grid) ----
    tc = t_cls_ref[...].astype(jnp.float32)             # (Ls, B, H) teacher[order]
    sc = s_cls_ref[...].astype(jnp.float32)             # (Ls, B, H) student
    t_n = tc * jax.lax.rsqrt(jnp.sum(tc * tc, axis=-1, keepdims=True))
    s_n = sc * jax.lax.rsqrt(jnp.sum(sc * sc, axis=-1, keepdims=True))
    d = s_n - t_n
    pkd_ref[0, 0] = jnp.sum(d * d) * (1.0 / d.size)


def _logits_only_kernel(t_logits_ref, s_logits_ref, labels_ref,
                        train_ref, soft_ref, *, temperature, logits_mse):
    """beta == 0 path: only the logits losses."""
    _logits_loss_body(t_logits_ref, s_logits_ref, labels_ref,
                      train_ref, soft_ref,
                      temperature=temperature, logits_mse=logits_mse)


# ----------------------------------------------------------------------------
# pallas_call wrappers
# ----------------------------------------------------------------------------
_SMEM_SCALAR = pl.BlockSpec(memory_space=pltpu.MemorySpace.SMEM)


def _fused_losses(t_logits, s_logits, labels2d, t_cls, s_cls,
                  *, temperature, logits_mse):
    B, C = s_logits.shape
    Ls, _, H = s_cls.shape
    train, soft, pkd = pl.pallas_call(
        functools.partial(_fused_kernel, temperature=temperature,
                          logits_mse=logits_mse),
        out_shape=(jax.ShapeDtypeStruct((1, 1), jnp.float32),
                   jax.ShapeDtypeStruct((1, 1), jnp.float32),
                   jax.ShapeDtypeStruct((1, 1), jnp.float32)),
        in_specs=[pl.BlockSpec((B, C), lambda: (0, 0)),
                  pl.BlockSpec((B, C), lambda: (0, 0)),
                  # NOTE: kept in VMEM as (B, 1) int32 — Mosaic SMEM refs only
                  # support scalar-indexed loads, and the vectorized one-hot
                  # compare needs the whole labels column.
                  pl.BlockSpec((B, 1), lambda: (0, 0)),
                  pl.BlockSpec((Ls, B, H), lambda: (0, 0, 0)),
                  pl.BlockSpec((Ls, B, H), lambda: (0, 0, 0))],
        out_specs=(_SMEM_SCALAR, _SMEM_SCALAR, _SMEM_SCALAR),
    )(t_logits, s_logits, labels2d, t_cls, s_cls)   # native dtypes, no f32 cast
    return train[0, 0], soft[0, 0], pkd[0, 0]


def _logits_losses(t_logits, s_logits, labels2d, *, temperature, logits_mse):
    B, C = s_logits.shape
    train, soft = pl.pallas_call(
        functools.partial(_logits_only_kernel, temperature=temperature,
                          logits_mse=logits_mse),
        out_shape=(jax.ShapeDtypeStruct((1, 1), jnp.float32),
                   jax.ShapeDtypeStruct((1, 1), jnp.float32)),
        in_specs=[pl.BlockSpec((B, C), lambda: (0, 0)),
                  pl.BlockSpec((B, C), lambda: (0, 0)),
                  pl.BlockSpec((B, 1), lambda: (0, 0))],
        out_specs=(_SMEM_SCALAR, _SMEM_SCALAR),
    )(t_logits, s_logits, labels2d)
    return train[0, 0], soft[0, 0]


# ----------------------------------------------------------------------------
# Module-level forward (mirrors MetaPatientDistillation.forward given the
# teacher / student model outputs).  Call under jax.jit so the CLS stack /
# order gather fuse with the single pallas_call.
# ----------------------------------------------------------------------------
def meta_patient_distillation_forward(t_outputs, s_outputs, order, labels, config):
    t_logits, t_features = t_outputs[0], t_outputs[-1]
    s_logits, s_features = s_outputs[0], s_outputs[-1]
    B = s_logits.shape[0]
    labels2d = labels.reshape(B, 1).astype(jnp.int32)

    if config['beta'] == 0:
        train_loss, soft_loss = _logits_losses(
            t_logits, s_logits, labels2d,
            temperature=config['temperature'], logits_mse=config['logits_mse'])
        return train_loss, soft_loss, jnp.zeros((), jnp.float32)

    # torch: cat(features[1:-1], 0).view(L-1, -1, S, H)[:, :, 0]; teacher layers
    # are then selected by `order`.  The gather happens here (tiny data, fused
    # under jit) so the kernel runs as one block with no grid.
    t_cls = jnp.stack([h[:, 0, :] for h in t_features[1:-1]], axis=0)
    t_cls = jnp.take(t_cls, order.astype(jnp.int32), axis=0)
    s_cls = jnp.stack([h[:, 0, :] for h in s_features[1:-1]], axis=0)

    return _fused_losses(t_logits, s_logits, labels2d, t_cls, s_cls,
                         temperature=config['temperature'],
                         logits_mse=config['logits_mse'])


# ----------------------------------------------------------------------------
# Deterministic stand-ins for the external teacher / student models (glue).
# ----------------------------------------------------------------------------
def make_stub_bert(key, vocab_size, hidden, num_layers, num_labels):
    ks = jax.random.split(key, num_layers + 3)
    return {
        'tok_emb': 0.1 * jax.random.normal(ks[0], (vocab_size, hidden), jnp.float32),
        'type_emb': 0.1 * jax.random.normal(ks[1], (2, hidden), jnp.float32),
        'layers': [jax.random.normal(ks[2 + i], (hidden, hidden), jnp.float32)
                   / jnp.sqrt(hidden) for i in range(num_layers)],
        'cls_w': 0.1 * jax.random.normal(ks[2 + num_layers], (hidden, num_labels),
                                         jnp.float32),
    }


def run_stub_bert(params, input_ids, token_type_ids, attention_mask):
    mask = attention_mask[..., None].astype(jnp.float32)
    h = (params['tok_emb'][input_ids] + params['type_emb'][token_type_ids]) * mask
    hidden_states = [h]
    for w in params['layers']:
        h = jnp.tanh(h @ w) * mask
        hidden_states.append(h)
    logits = h[:, 0, :] @ params['cls_w']
    return logits, tuple(hidden_states)


if __name__ == "__main__":
    B, S, C = 2, 8, 2            # batch, max_seq_length, num_labels
    HIDDEN = 32
    T_LAYERS, S_LAYERS = 7, 4    # teacher / student num_hidden_layers
    VOCAB = 50

    key = jax.random.PRNGKey(0)
    k_ids, k_types, k_lab, k_t, k_s = jax.random.split(key, 5)
    input_ids = jax.random.randint(k_ids, (B, S), 0, VOCAB)
    token_type_ids = jax.random.randint(k_types, (B, S), 0, 2)
    attention_mask = jnp.ones((B, S), jnp.int32)
    labels = jax.random.randint(k_lab, (B,), 0, C)

    t_params = make_stub_bert(k_t, VOCAB, HIDDEN, T_LAYERS, C)
    s_params = make_stub_bert(k_s, VOCAB, HIDDEN, S_LAYERS, C)

    t_logits, t_hidden = run_stub_bert(t_params, input_ids, token_type_ids,
                                       attention_mask)
    s_logits, s_hidden = run_stub_bert(s_params, input_ids, token_type_ids,
                                       attention_mask)

    config = {'logits_mse': False, 'temperature': 2.0, 'beta': 100.0,
              'label_id_params': {'max_seq_length': S}}
    order = jnp.array([1, 3, 5], dtype=jnp.int32)   # teacher layers used by PKD

    # One jitted wrapper: CLS stack + order gather + single fused pallas_call.
    fwd = jax.jit(functools.partial(meta_patient_distillation_forward,
                                    config=config))
    train_loss, soft_loss, pkd_loss = fwd((t_logits, t_hidden),
                                          (s_logits, s_hidden), order, labels)
    jax.block_until_ready((train_loss, soft_loss, pkd_loss))

    # beta == 0 path (logits-only kernel).
    config0 = dict(config, beta=0)
    fwd0 = jax.jit(functools.partial(meta_patient_distillation_forward,
                                     config=config0))
    train0, soft0, pkd0 = fwd0((t_logits, t_hidden), (s_logits, s_hidden),
                               order, labels)
    jax.block_until_ready((train0, soft0, pkd0))

    # Silent pure-JAX reference check.
    Temp = config['temperature']
    logp = jax.nn.log_softmax(s_logits, axis=-1)
    ref_train = -jnp.mean(jnp.take_along_axis(logp, labels[:, None], axis=1))
    ref_soft = jnp.mean((jax.nn.softmax(t_logits / Temp, -1)
                         - jax.nn.softmax(s_logits / Temp, -1)) ** 2) * Temp * Temp
    t_cls_ref = jnp.stack([h[:, 0, :] for h in t_hidden[1:-1]], axis=0)[order]
    s_cls_ref = jnp.stack([h[:, 0, :] for h in s_hidden[1:-1]], axis=0)
    t_n = t_cls_ref / jnp.linalg.norm(t_cls_ref, axis=-1, keepdims=True)
    s_n = s_cls_ref / jnp.linalg.norm(s_cls_ref, axis=-1, keepdims=True)
    ref_pkd = jnp.mean((s_n - t_n) ** 2)

    assert np.allclose(np.asarray(train_loss), np.asarray(ref_train),
                       rtol=1e-5, atol=1e-6)
    assert np.allclose(np.asarray(soft_loss), np.asarray(ref_soft),
                       rtol=1e-5, atol=1e-6)
    assert np.allclose(np.asarray(pkd_loss), np.asarray(ref_pkd),
                       rtol=1e-5, atol=1e-6)
    assert np.allclose(np.asarray(train0), np.asarray(ref_train),
                       rtol=1e-5, atol=1e-6)
    assert np.allclose(np.asarray(soft0), np.asarray(ref_soft),
                       rtol=1e-5, atol=1e-6)
    assert np.asarray(pkd0) == 0.0

    print("KERNEL_OK")
</pallas_src>

<mosaic_0001>
module attributes {stable_mosaic.version = 11 : i64} {
  func.func @_fused_kernel(%arg0: memref<2x2xf32, #tpu.memory_space<vmem>>, %arg1: memref<2x2xf32, #tpu.memory_space<vmem>>, %arg2: memref<2x1xi32, #tpu.memory_space<vmem>>, %arg3: memref<3x2x32xf32, #tpu.memory_space<vmem>>, %arg4: memref<3x2x32xf32, #tpu.memory_space<vmem>>, %arg5: memref<1x1xf32, #tpu.memory_space<smem>>, %arg6: memref<1x1xf32, #tpu.memory_space<smem>>, %arg7: memref<1x1xf32, #tpu.memory_space<smem>>) attributes {dimension_semantics = [], scalar_prefetch = 0 : i64, scratch_operands = 0 : i64, tpu.core_type = #tpu.core_type<tc>} {
    %c0 = arith.constant 0 : index
    %c0_0 = arith.constant 0 : index
    %0 = vector.load %arg0[%c0, %c0_0] : memref<2x2xf32, #tpu.memory_space<vmem>>, vector<2x2xf32>
    %c0_1 = arith.constant 0 : index
    %c0_2 = arith.constant 0 : index
    %1 = vector.load %arg1[%c0_1, %c0_2] : memref<2x2xf32, #tpu.memory_space<vmem>>, vector<2x2xf32>
    %cst = arith.constant dense<0xFF800000> : vector<2xf32>
    %2 = vector.multi_reduction <maximumf>, %1, %cst [1] : vector<2x2xf32> to vector<2xf32>
    %3 = vector.shape_cast %2 : vector<2xf32> to vector<2x1xf32>
    %4 = vector.broadcast %3 : vector<2x1xf32> to vector<2x2xf32>
    %5 = arith.subf %1, %4 : vector<2x2xf32>
    %6 = math.exp %5 : vector<2x2xf32>
    %cst_3 = arith.constant dense<0.000000e+00> : vector<2xf32>
    %7 = vector.multi_reduction <add>, %6, %cst_3 [1] : vector<2x2xf32> to vector<2xf32>
    %8 = vector.shape_cast %7 : vector<2xf32> to vector<2x1xf32>
    %9 = math.log %8 : vector<2x1xf32>
    %10 = vector.broadcast %9 : vector<2x1xf32> to vector<2x2xf32>
    %11 = arith.subf %5, %10 : vector<2x2xf32>
    %12 = tpu.iota {dimensions = array<i32: 1>} : vector<2x2xi32>
    %c0_4 = arith.constant 0 : index
    %c0_5 = arith.constant 0 : index
    %13 = vector.load %arg2[%c0_4, %c0_5] : memref<2x1xi32, #tpu.memory_space<vmem>>, vector<2x1xi32>
    %14 = vector.broadcast %13 : vector<2x1xi32> to vector<2x2xi32>
    %15 = arith.cmpi eq, %12, %14 : vector<2x2xi32>
    %16 = arith.extui %15 : vector<2x2xi1> to vector<2x2xi32>
    %17 = arith.sitofp %16 : vector<2x2xi32> to vector<2x2xf32>
    %18 = arith.mulf %17, %11 : vector<2x2xf32>
    %19 = vector.shape_cast %18 : vector<2x2xf32> to vector<1x2x2xf32>
    %cst_6 = arith.constant dense<0.000000e+00> : vector<1xf32>
    %20 = vector.multi_reduction <add>, %19, %cst_6 [1, 2] : vector<1x2x2xf32> to vector<1xf32>
    %21 = vector.shape_cast %20 : vector<1xf32> to vector<1x1x1xf32>
    %22 = vector.extract %21[0, 0, 0] : f32 from vector<1x1x1xf32>
    %cst_7 = arith.constant 0.000000e+00 : f32
    %23 = arith.subf %cst_7, %22 : f32
    %cst_8 = arith.constant 5.000000e-01 : f32
    %24 = arith.mulf %23, %cst_8 : f32
    %c0_9 = arith.constant 0 : index
    %c0_10 = arith.constant 0 : index
    %25 = memref.load %arg5[%c0_9, %c0_10] : memref<1x1xf32, #tpu.memory_space<smem>>
    memref.store %24, %arg5[%c0_9, %c0_10] : memref<1x1xf32, #tpu.memory_space<smem>>
    %cst_11 = arith.constant 5.000000e-01 : f32
    %26 = vector.broadcast %cst_11 : f32 to vector<2x2xf32>
    %27 = arith.mulf %5, %26 : vector<2x2xf32>
    %28 = math.exp %27 : vector<2x2xf32>
    %cst_12 = arith.constant dense<0.000000e+00> : vector<2xf32>
    %29 = vector.multi_reduction <add>, %28, %cst_12 [1] : vector<2x2xf32> to vector<2xf32>
    %30 = vector.shape_cast %29 : vector<2xf32> to vector<2x1xf32>
    %31 = tpu.reciprocal %30 : vector<2x1xf32> -> vector<2x1xf32>
    %32 = vector.broadcast %31 : vector<2x1xf32> to vector<2x2xf32>
    %33 = arith.mulf %28, %32 : vector<2x2xf32>
    %cst_13 = arith.constant dense<0xFF800000> : vector<2xf32>
    %34 = vector.multi_reduction <maximumf>, %0, %cst_13 [1] : vector<2x2xf32> to vector<2xf32>
    %35 = vector.shape_cast %34 : vector<2xf32> to vector<2x1xf32>
    %36 = vector.broadcast %35 : vector<2x1xf32> to vector<2x2xf32>
    %37 = arith.subf %0, %36 : vector<2x2xf32>
    %cst_14 = arith.constant 5.000000e-01 : f32
    %38 = vector.broadcast %cst_14 : f32 to vector<2x2xf32>
    %39 = arith.mulf %37, %38 : vector<2x2xf32>
    %40 = math.exp %39 : vector<2x2xf32>
    %cst_15 = arith.constant dense<0.000000e+00> : vector<2xf32>
    %41 = vector.multi_reduction <add>, %40, %cst_15 [1] : vector<2x2xf32> to vector<2xf32>
    %42 = vector.shape_cast %41 : vector<2xf32> to vector<2x1xf32>
    %43 = tpu.reciprocal %42 : vector<2x1xf32> -> vector<2x1xf32>
    %44 = vector.broadcast %43 : vector<2x1xf32> to vector<2x2xf32>
    %45 = arith.mulf %40, %44 : vector<2x2xf32>
    %46 = arith.subf %45, %33 : vector<2x2xf32>
    %47 = arith.mulf %46, %46 : vector<2x2xf32>
    %48 = vector.shape_cast %47 : vector<2x2xf32> to vector<1x2x2xf32>
    %cst_16 = arith.constant dense<0.000000e+00> : vector<1xf32>
    %49 = vector.multi_reduction <add>, %48, %cst_16 [1, 2] : vector<1x2x2xf32> to vector<1xf32>
    %50 = vector.shape_cast %49 : vector<1xf32> to vector<1x1x1xf32>
    %51 = vector.extract %50[0, 0, 0] : f32 from vector<1x1x1xf32>
    %cst_17 = arith.constant 2.500000e-01 : f32
    %52 = arith.mulf %51, %cst_17 : f32
    %cst_18 = arith.constant 4.000000e+00 : f32
    %53 = arith.mulf %52, %cst_18 : f32
    %c0_19 = arith.constant 0 : index
    %c0_20 = arith.constant 0 : index
    %54 = memref.load %arg6[%c0_19, %c0_20] : memref<1x1xf32, #tpu.memory_space<smem>>
    memref.store %53, %arg6[%c0_19, %c0_20] : memref<1x1xf32, #tpu.memory_space<smem>>
    %c0_21 = arith.constant 0 : index
    %c0_22 = arith.constant 0 : index
    %c0_23 = arith.constant 0 : index
    %55 = vector.load %arg3[%c0_21, %c0_22, %c0_23] : memref<3x2x32xf32, #tpu.memory_space<vmem>>, vector<3x2x32xf32>
    %c0_24 = arith.constant 0 : index
    %c0_25 = arith.constant 0 : index
    %c0_26 = arith.constant 0 : index
    %56 = vector.load %arg4[%c0_24, %c0_25, %c0_26] : memref<3x2x32xf32, #tpu.memory_space<vmem>>, vector<3x2x32xf32>
    %57 = arith.mulf %55, %55 : vector<3x2x32xf32>
    %cst_27 = arith.constant dense<0.000000e+00> : vector<3x2xf32>
    %58 = vector.multi_reduction <add>, %57, %cst_27 [2] : vector<3x2x32xf32> to vector<3x2xf32>
    %59 = vector.shape_cast %58 : vector<3x2xf32> to vector<3x2x1xf32>
    %60 = math.rsqrt %59 : vector<3x2x1xf32>
    %61 = vector.broadcast %60 : vector<3x2x1xf32> to vector<3x2x32xf32>
    %62 = arith.mulf %55, %61 : vector<3x2x32xf32>
    %63 = arith.mulf %56, %56 : vector<3x2x32xf32>
    %cst_28 = arith.constant dense<0.000000e+00> : vector<3x2xf32>
    %64 = vector.multi_reduction <add>, %63, %cst_28 [2] : vector<3x2x32xf32> to vector<3x2xf32>
    %65 = vector.shape_cast %64 : vector<3x2xf32> to vector<3x2x1xf32>
    %66 = math.rsqrt %65 : vector<3x2x1xf32>
    %67 = vector.broadcast %66 : vector<3x2x1xf32> to vector<3x2x32xf32>
    %68 = arith.mulf %56, %67 : vector<3x2x32xf32>
    %69 = arith.subf %68, %62 : vector<3x2x32xf32>
    %70 = arith.mulf %69, %69 : vector<3x2x32xf32>
    %71 = vector.shape_cast %70 : vector<3x2x32xf32> to vector<1x3x2x32xf32>
    %cst_29 = arith.constant dense<0.000000e+00> : vector<1xf32>
    %72 = vector.multi_reduction <add>, %71, %cst_29 [1, 2, 3] : vector<1x3x2x32xf32> to vector<1xf32>
    %73 = vector.shape_cast %72 : vector<1xf32> to vector<1x1x1x1xf32>
    %74 = vector.extract %73[0, 0, 0, 0] : f32 from vector<1x1x1x1xf32>
    %cst_30 = arith.constant 0.00520833349 : f32
    %75 = arith.mulf %74, %cst_30 : f32
    %c0_31 = arith.constant 0 : index
    %c0_32 = arith.constant 0 : index
    %76 = memref.load %arg7[%c0_31, %c0_32] : memref<1x1xf32, #tpu.memory_space<smem>>
    memref.store %75, %arg7[%c0_31, %c0_32] : memref<1x1xf32, #tpu.memory_space<smem>>
    return
  }
}

</mosaic_0001>

<bundles_post_ra>
// kernel: meta_patient_distillation_forward.1
= control target key start
LH: loop header
LB: loop body
LE: loop exit
PB: predicated region body
PF: predicated region fallthrough
CT: control target
= control target key end

     0   :  { %13 = vsyncpa [#allocation3], 0  ;;  %vm27_vm0 = vcmask 9216   ;;  %vm135_vm1 = vcmask 254976   ;;  %s572_s0 = inlined_call_operand.vmem [shape: f32[2,2], index: 0, kind: input, shape index: {}]   ;;  %s573_s1 = inlined_call_operand.vmem [shape: f32[2,2], index: 1, kind: input, shape index: {}]   ;;  %s574_s2 = inlined_call_operand.vmem [shape: s32[2,1], index: 2, kind: input, shape index: {}]   ;;  %s575_s3 = inlined_call_operand.vmem [shape: f32[3,2,32], index: 3, kind: input, shape index: {}]   ;;  %s576_s4 = inlined_call_operand.vmem [shape: f32[3,2,32], index: 4, kind: input, shape index: {}]   ;;  %s577_s5 = inlined_call_operand.hbm [shape: f32[1,1], index: 5, kind: output, shape index: {0}]   ;;  %s578_s6 = inlined_call_operand.hbm [shape: f32[1,1], index: 6, kind: output, shape index: {1}]   ;;  %s579_s7 = inlined_call_operand.hbm [shape: f32[1,1], index: 7, kind: output, shape index: {2}]  }
   0x1   :  { %v26_v0 = vld [vmem:[%s573_s1] sm:$0x3] }
   0x2   :  { %v28_v1 = vsel %vm27_vm0, %v26_v0, -inf  ;;  %v418_v2 = vld [vmem:[%s576_s4] sm:$0x3] }
   0x3   :  { %v423_v3 = vld [vmem:[%s575_s3] sm:$0x3]  ;;  %29 = vmax.xlane.f32.xlu0 %v28_v1  ;;  %v178_v4 = vmul.f32 %v418_v2, %v418_v2 }
   0x4   :  { %v132_v5 = vmul.f32 %v423_v3, %v423_v3 }
   0x5   :  { %14 = vsyncpa [#allocation5], 0  ;;  %v432_v6 = vld [vmem:[%s576_s4 + $0x2] sm:$0x3]  ;;  %v25_v8 = vld [vmem:[%s572_s0] sm:$0x3] }
   0x6   :  { %v437_v7 = vld [vmem:[%s575_s3 + $0x2] sm:$0x3]  ;;  %v181_v9 = vsel %vm135_vm1, %v178_v4, 0.0  ;;  %v136_v10 = vsel %vm135_vm1, %v132_v5, 0.0  ;;  %v179_v11 = vmul.f32 %v432_v6, %v432_v6  ;;  %v85_v13 = vsel %vm27_vm0, %v25_v8, -inf  ;;  %s260_s16 = sshll.u32 %s578_s6, 4  ;;  %s261_s16 = int_to_ptr.hbm [resolvable:$true] %s260_s16 }
   0x7   :  { %182 = vadd.xlane.f32.xlu2 %v181_v9  ;;  %137 = vadd.xlane.f32.xlu1 %v136_v10  ;;  %v133_v12 = vmul.f32 %v437_v7, %v437_v7  ;;  %v454_v16 = vld [vmem:[%s575_s3 + $0x4] sm:$0x3]  ;;  %v366_v20 = vmov 0   ;;  %v42_v21 = vld [vmem:[%s574_s2] sm:$0x3]  ;;  %s251_s21 = sshll.u32 %s577_s5, 4  ;;  %s252_s21 = int_to_ptr.hbm [resolvable:$true] %s251_s21 }
   0x8   :  { %v184_v14 = vsel %vm135_vm1, %v179_v11, 0.0  ;;  %v134_v17 = vmul.f32 %v454_v16, %v454_v16  ;;  %300 = vset.pattern.permute.xlu2 %v366_v20  ;;  %301 = vset.pattern.permute.xlu0 %v366_v20  ;;  %v470_v30 = vld [vmem:[%s576_s4 + $0x4] sm:$0x3]  ;;  %s269_s26 = sshll.u32 %s579_s7, 4  ;;  %s368_s29 = smov [#allocation2]   ;;  %s270_s26 = int_to_ptr.hbm [resolvable:$true] %s269_s26 }
   0x9   :  { %v139_v15 = vsel %vm135_vm1, %v133_v12, 0.0  ;;  %v180_v32 = vmul.f32 %v470_v30, %v470_v30  ;;  %s369_s30 = smov [#allocation4]   ;;  %s370_s5 = smov [#allocation6]  }
   0xa   :  { %v142_v18 = vsel %vm135_vm1, %v134_v17, 0.0 }
   0xb   :  { %86 = vmax.xlane.f32.xlu0 %v85_v13  ;;  %v187_v34 = vsel %vm135_vm1, %v180_v32, 0.0 }
   0xf   :  { %185 = vadd.xlane.f32.xlu2 %v184_v14  ;;  %140 = vadd.xlane.f32.xlu1 %v139_v15 }
  0x17   :  { %143 = vadd.xlane.f32.xlu2 %v142_v18 }
  0x2f   :  { %44 = vperm.xlu2 %300, %v42_v21  }
  0x76   :  { %v30_v19 = vpop.xlane.xlu0 %29 }
  0x77   :  { %v462_v22 = vsub.f32 %v26_v0, %v30_v19 }
  0x79   :  { %v64_v23 = vmul.f32 0.5, %v462_v22  ;;  %v32_v33 = vmul.f32 1.442695, %v462_v22 }
  0x7a   :  { %v183_v39 = vpop.xlane.xlu2 %182  ;;  %v138_v40 = vpop.xlane.xlu1 %137 }
  0x7b   :  { %v65_v24 = vmul.f32 1.442695, %v64_v23  ;;  %vm196_vm2 = vweird.f32 %v183_v39  ;;  %vm151_vm4 = vweird.f32 %v138_v40 }
  0x7d   :  { %302 = vpow2.f32 %v65_v24 }
  0x7e   :  { %v87_v25 = vpop.xlane.xlu0 %86 }
  0x7f   :  { %v88_v26 = vsub.f32 %v25_v8, %v87_v25 }
  0x81   :  { %v89_v27 = vmul.f32 0.5, %v88_v26 }
  0x82   :  { %v186_v41 = vpop.xlane.xlu2 %185  ;;  %v141_v42 = vpop.xlane.xlu1 %140 }
  0x83   :  { %v465_v28 = vpop.eup %302  ;;  %v90_v29 = vmul.f32 1.442695, %v89_v27  ;;  %vm206_vm6 = vweird.f32 %v186_v41  ;;  %vm161_vm9 = vweird.f32 %v141_v42 }
  0x84   :  { %v67_v31 = vsel %vm27_vm0, %v465_v28, 0.0 }
  0x85   :  { %304 = vpow2.f32 %v90_v29  ;;  %68 = vadd.xlane.f32.xlu0 %v67_v31  ;;  %v40_v31 = vlaneseq }
  0x86   :  { %306 = vpow2.f32 %v32_v33 }
  0x87   :  { %308 = vrsqrt.f32 %v183_v39 }
  0x88   :  { %310 = vrsqrt.f32 %v138_v40 }
  0x89   :  { %312 = vrsqrt.f32 %v186_v41 }
  0x8a   :  { %314 = vrsqrt.f32 %v141_v42  ;;  %v483_v48 = vpop.xlane.xlu2 %143 }
  0x8b   :  { %v478_v35 = vpop.eup %304  ;;  %316 = vrsqrt.f32 %v483_v48  ;;  %vm171_vm14 = vweird.f32 %v483_v48 }
  0x8c   :  { %v92_v36 = vsel %vm27_vm0, %v478_v35, 0.0  ;;  %v307_v37 = vpop.eup %306 }
  0x8d   :  { %188 = vadd.xlane.f32.xlu0 %v187_v34  ;;  %93 = vadd.xlane.f32.xlu1 %v92_v36  ;;  %v34_v38 = vsel %vm27_vm0, %v307_v37, 0.0  ;;  %v309_v43 = vpop.eup %308 }
  0x8e   :  { %v311_v44 = vpop.eup %310  ;;  %v191_v47 = vmul.f32 %v309_v43, %v183_v39  ;;  %vm197_vm3 = vweird.f32 %v309_v43 }
  0x8f   :  { %v313_v45 = vpop.eup %312  ;;  %v146_v49 = vmul.f32 %v311_v44, %v138_v40  ;;  %vm152_vm5 = vweird.f32 %v311_v44  ;;  %vm493_vm8 = vmor %vm196_vm2, %vm197_vm3 }
  0x90   :  { %v315_v46 = vpop.eup %314  ;;  %v201_v50 = vmul.f32 %v313_v45, %v186_v41  ;;  %v192_v52 = vmul.f32 %v309_v43, %v191_v47  ;;  %vm207_vm7 = vweird.f32 %v313_v45  ;;  %vm499_vm11 = vmor %vm151_vm4, %vm152_vm5 }
  0x91   :  { %v156_v51 = vmul.f32 %v315_v46, %v141_v42  ;;  %v147_v53 = vmul.f32 %v311_v44, %v146_v49  ;;  %v486_v57 = vpop.eup %316  ;;  %vm162_vm10 = vweird.f32 %v315_v46  ;;  %vm504_vm12 = vmor %vm206_vm6, %vm207_vm7  ;;  %v41_v42 = vand.u32 127, %v40_v31 }
  0x92   :  { %v202_v54 = vmul.f32 %v313_v45, %v201_v50  ;;  %v193_v56 = vmul.f32 0.5, %v192_v52  ;;  %v166_v63 = vmul.f32 %v486_v57, %v483_v48  ;;  %vm163_vm13 = vmor %vm161_vm9, %vm162_vm10  ;;  %vm172_vm2 = vweird.f32 %v486_v57  ;;  %v45_v47 = vpop.permute.xlu2 %44 }
  0x93   :  { %v157_v55 = vmul.f32 %v315_v46, %v156_v51  ;;  %v148_v58 = vmul.f32 0.5, %v147_v53  ;;  %vm544_vm6 = vmor %vm171_vm14, %vm172_vm2 }
  0x94   :  { %v203_v59 = vmul.f32 0.5, %v202_v54  ;;  %v194_v62 = vsub.f32 1.5, %v193_v56  ;;  %v167_v11 = vmul.f32 %v486_v57, %v166_v63 }
  0x95   :  { %35 = vadd.xlane.f32.xlu1 %v34_v38  ;;  %v158_v60 = vmul.f32 0.5, %v157_v55  ;;  %v149_v0 = vsub.f32 1.5, %v148_v58 }
  0x96   :  { %v204_v1 = vsub.f32 1.5, %v203_v59  ;;  %v195_v9 = vmul.f32 %v309_v43, %v194_v62  ;;  %v168_v23 = vmul.f32 0.5, %v167_v11 }
  0x97   :  { %v159_v4 = vsub.f32 1.5, %v158_v60  ;;  %v150_v12 = vmul.f32 %v311_v44, %v149_v0 }
  0x98   :  { %v205_v13 = vmul.f32 %v313_v45, %v204_v1  ;;  %v199_v21 = vsel %vm493_vm8, %v309_v43, %v195_v9  ;;  %v169_v37 = vsub.f32 1.5, %v168_v23  ;;  %vm46_vm8 = vcmp.eq.s32.totalorder %v41_v42, %v45_v47 }
  0x99   :  { %v160_v15 = vmul.f32 %v315_v46, %v159_v4  ;;  %v154_v24 = vsel %vm499_vm11, %v311_v44, %v150_v12  ;;  %v220_v29 = vmul.f32 %v199_v21, %v418_v2  ;;  %v367_v4 = vmov 0.0  }
  0x9a   :  { %v209_v25 = vsel %vm504_vm12, %v313_v45, %v205_v13  ;;  %v175_v33 = vmul.f32 %v154_v24, %v423_v3  ;;  %v170_v43 = vmul.f32 %v486_v57, %v169_v37  ;;  %v288_v5 = vsel %vm46_vm8, 1.0, %v367_v4 }
  0x9b   :  { %v164_v26 = vsel %vm163_vm13, %v315_v46, %v160_v15  ;;  %v221_v34 = vmul.f32 %v209_v25, %v432_v6 }
  0x9c   :  { %v176_v36 = vmul.f32 %v164_v26, %v437_v7  ;;  %v223_v49 = vsub.f32 %v220_v29, %v175_v33  ;;  %v174_v48 = vsel %vm544_vm6, %v486_v57, %v170_v43 }
  0x9e   :  { %v224_v56 = vsub.f32 %v221_v34, %v176_v36  ;;  %v226_v13 = vmul.f32 %v223_v49, %v223_v49 }
  0xa0   :  { %v227_v57 = vmul.f32 %v224_v56, %v224_v56 }
  0xf8   :  { %v488_v61 = vpop.xlane.xlu0 %68 }
  0xf9   :  { %318 = vrcp.f32 %v488_v61  ;;  %v81_v2 = vand.u32 2147483648, %v488_v61  ;;  %vm75_vm3 = vweird.f32 %v488_v61  ;;  %v79_v6 = vand.u32 2147483647, %v488_v61 }
  0xfb   :  { %v82_v54 = vor.u32 1.1754944e-38, %v81_v2  ;;  %vm80_vm9 = vcmp.eq.f32.partialorder %v79_v6, 8.507059e+37 }
  0xff   :  { %v497_v8 = vpop.eup %318 }
 0x100   :  { %v71_v17 = vmul.f32 %v497_v8, %v488_v61  ;;  %v94_v18 = vpop.xlane.xlu1 %93  ;;  %v510_v19 = vpop.xlane.xlu0 %188  ;;  %vm76_vm15 = vweird.f32 %v497_v8 }
 0x101   :  { %320 = vrcp.f32 %v94_v18  ;;  %vm533_vm4 = vmor %vm75_vm3, %vm76_vm15  ;;  %v106_v45 = vand.u32 2147483648, %v94_v18  ;;  %v104_v51 = vand.u32 2147483647, %v94_v18  ;;  %vm100_vm7 = vweird.f32 %v94_v18 }
 0x102   :  { %v72_v20 = vsub.f32 1.0, %v71_v17  ;;  %322 = vrsqrt.f32 %v510_v19  ;;  %vm216_vm13 = vweird.f32 %v510_v19  ;;  %v177_v17 = vmul.f32 %v174_v48, %v454_v16 }
 0x103   :  { %v107_v60 = vor.u32 1.1754944e-38, %v106_v45  ;;  %vm105_vm12 = vcmp.eq.f32.partialorder %v104_v51, 8.507059e+37 }
 0x104   :  { %v73_v27 = vmul.f32 %v497_v8, %v72_v20 }
 0x106   :  { %v74_v41 = vadd.f32 %v497_v8, %v73_v27 }
 0x107   :  { %v321_v32 = vpop.eup %320 }
 0x108   :  { %v323_v38 = vpop.eup %322  ;;  %v96_v39 = vmul.f32 %v321_v32, %v94_v18  ;;  %v36_v40 = vpop.xlane.xlu1 %35  ;;  %vm101_vm5 = vweird.f32 %v321_v32  ;;  %v78_v52 = vsel %vm533_vm4, %v497_v8, %v74_v41 }
 0x109   :  { %v211_v3 = vmul.f32 %v323_v38, %v510_v19  ;;  %324 = vlog2.f32 %v36_v40  ;;  %vm102_vm10 = vmor %vm100_vm7, %vm101_vm5  ;;  %vm217_vm11 = vweird.f32 %v323_v38  ;;  %v83_v62 = vsel %vm80_vm9, %v82_v54, %v78_v52 }
 0x10a   :  { %v97_v7 = vsub.f32 1.0, %v96_v39  ;;  %vm218_vm14 = vmor %vm216_vm13, %vm217_vm11  ;;  %v84_v10 = vmul.f32 %v465_v28, %v83_v62  ;;  %v229_v28 = vsel %vm135_vm1, %v226_v13, 0.0 }
 0x10b   :  { %v212_v46 = vmul.f32 %v323_v38, %v211_v3 }
 0x10c   :  { %v98_v50 = vmul.f32 %v321_v32, %v97_v7 }
 0x10d   :  { %v213_v55 = vmul.f32 0.5, %v212_v46 }
 0x10e   :  { %v99_v58 = vadd.f32 %v321_v32, %v98_v50 }
 0x10f   :  { %v325_v59 = vpop.eup %324  ;;  %v214_v61 = vsub.f32 1.5, %v213_v55 }
 0x110   :  { %v38_v63 = vmul.f32 0.6931472, %v325_v59  ;;  %v103_v0 = vsel %vm102_vm10, %v321_v32, %v99_v58 }
 0x111   :  { %v215_v1 = vmul.f32 %v323_v38, %v214_v61  ;;  %v108_v8 = vsel %vm105_vm12, %v107_v60, %v103_v0 }
 0x112   :  { %v39_v9 = vsub.f32 %v462_v22, %v38_v63  ;;  %v109_v11 = vmul.f32 %v478_v35, %v108_v8  ;;  %v230_v35 = vsel %vm135_vm1, %v227_v57, 0.0 }
 0x113   :  { %v219_v12 = vsel %vm218_vm14, %v323_v38, %v215_v1  ;;  %v231_v25 = vadd.f32 %v230_v35, %v229_v28 }
 0x114   :  { %v49_v14 = vmul.f32 %v288_v5, %v39_v9  ;;  %v110_v15 = vsub.f32 %v109_v11, %v84_v10  ;;  %v222_v18 = vmul.f32 %v219_v12, %v470_v30 }
 0x116   :  { %v50_v19 = vsel %vm27_vm0, %v49_v14, 0.0  ;;  %v111_v20 = vmul.f32 %v110_v15, %v110_v15  ;;  %v225_v21 = vsub.f32 %v222_v18, %v177_v17 }
 0x117   :  { %51 = vadd.xlane.f32.xlu0 %v50_v19 }
 0x118   :  { %v112_v22 = vsel %vm27_vm0, %v111_v20, 0.0  ;;  %v228_v23 = vmul.f32 %v225_v21, %v225_v21 }
 0x119   :  { %113 = vadd.xlane.f32.xlu1 %v112_v22 }
 0x11a   :  { %v232_v24 = vsel %vm135_vm1, %v228_v23, 0.0 }
 0x11b   :  { %v233_v26 = vadd.f32 %v232_v24, %v231_v25 }
 0x11f   :  { %234 = vadd.xlane.f32.xlu0 %v233_v26 }
 0x18a   :  { %v52_v16 = vpop.xlane.xlu0 %51 }
 0x18b   :  { %v53_v30 = vrot.slane %v52_v16, 4 }
 0x18c   :  { %v114_v27 = vpop.xlane.xlu1 %113 }
 0x18d   :  { %v54_v29 = vadd.f32 %v53_v30, %v52_v16  ;;  %v115_v31 = vrot.slane %v114_v27, 4 }
 0x18f   :  { %v55_v32 = vrot.slane %v54_v29, 2  ;;  %v116_v33 = vadd.f32 %v115_v31, %v114_v27 }
 0x191   :  { %v117_v34 = vrot.slane %v116_v33, 2  ;;  %v56_v36 = vadd.f32 %v55_v32, %v54_v29 }
 0x192   :  { %v235_v37 = vpop.xlane.xlu0 %234 }
 0x193   :  { %v118_v38 = vadd.f32 %v117_v34, %v116_v33  ;;  %v236_v39 = vrot.slane %v235_v37, 4  ;;  %v57_v40 = vrot.slane %v56_v36, 1 }
 0x195   :  { %v237_v41 = vadd.f32 %v236_v39, %v235_v37  ;;  %v58_v2 = vadd.f32 %v57_v40, %v56_v36  ;;  %v119_v3 = vrot.slane %v118_v38, 1 }
 0x197   :  { %v238_v6 = vrot.slane %v237_v41, 2  ;;  %289 = vpush %v58_v2  ;;  %v120_v7 = vadd.f32 %v119_v3, %v118_v38 }
 0x199   :  { %v239_v42 = vadd.f32 %v238_v6, %v237_v41  ;;  %291 = vpush %v120_v7 }
 0x19b   :  { %v240_v43 = vrot.slane %v239_v42, 1 }
 0x19d   :  { %v241_v44 = vadd.f32 %v240_v43, %v239_v42 }
 0x19f   :  { %293 = vpush %v241_v44 }
 0x1c8   :  { %s290_s17 = spop %289 }
 0x1c9   :  { %s60_s18 = ssub.f32 0.0, %s290_s17 }
 0x1ca   :  { %s292_s22 = spop %291 }
 0x1cb   :  { %s61_s23 = smul.f32 0.5, %s60_s18 }
 0x1cc   :  { %s122_s27 = smul.f32 0.25, %s292_s22 }
 0x1cd   :  { %63 = sst [smem:[#allocation2]] %s61_s23 }
 0x1ce   :  { %s123_s28 = smul.f32 4.0, %s122_s27 }
 0x1cf   :  { %254 = dma.smem_to_hbm %s368_s29, 16, %s252_s21, [#allocation3]  }
 0x1d0   :  { %125 = sst [smem:[#allocation4]] %s123_s28  ;;  %s294_s6 = spop %293 }
 0x1d1   :  { %s243_s1 = smul.f32 0.0052083335, %s294_s6 }
 0x1d2   :  { %263 = dma.smem_to_hbm %s369_s30, 16, %s261_s16, [#allocation5]  }
 0x1d3   :  { %245 = sst [smem:[#allocation6]] %s243_s1 }
 0x1d4   :  { %272 = dma.smem_to_hbm %s370_s5, 16, %s270_s26, [#allocation5]  }
 0x1d5   :  { %362 = dma.done.wait [#allocation3], 16  }
 0x1d6   :  { %363 = vsyncadd [#allocation3], 4294967280 }
 0x1d7   :  { %364 = dma.done.wait [#allocation5], 32  }
 0x1d8   :  { %365 = vsyncadd [#allocation5], 4294967264 }
 0x1d9   :  { %285 = sfence }
 0x1da   :  { %286 = vsyncpa [#allocation3], 1 }
 0x1db   :  { %287 = vsyncpa [#allocation5], 1 }

</bundles_post_ra>
